<compile_context>
chip_gen: v7x
topology: tpu7x:2x2x1
jax: 0.10.0
libtpu: 0.0.40
codegen_flags: <defaults>
</compile_context>

<pallas_src>
import jax
import jax.numpy as jnp
import numpy as np
from jax.experimental import pallas as pl
from jax.experimental.pallas import tpu as pltpu

SMOOTH = 1e-5
_LANES = 128


def _make_kernel(C):
    """One (batch, partial, spatial-tile) grid step.

    x_ref   : (1, C, tile_rows, 128) digit block in VMEM
    lab_ref : (1, tile_rows, 128)    int32 label block in VMEM
    inter_ref, psum_ref : (1, C, 1, 128) output blocks, resident across the
        spatial grid axis (accumulators), written back once per (n, p).
    """

    def kernel(x_ref, lab_ref, inter_ref, psum_ref):
        t = pl.program_id(2)

        @pl.when(t == 0)
        def _init():
            inter_ref[...] = jnp.zeros_like(inter_ref)
            psum_ref[...] = jnp.zeros_like(psum_ref)

        lab = lab_ref[0]                                          # (rows, 128) i32
        # Upcast to f32 (storage may be bf16; math stays f32 on all gens).
        xs = [x_ref[0, c].astype(jnp.float32) for c in range(C)]  # (rows, 128)

        # Softmax over channels: elementwise across the C slabs (VPU + EUP),
        # no cross-lane XLU work.
        m = xs[0]
        for c in range(1, C):
            m = jnp.maximum(m, xs[c])
        es = [jnp.exp(xs[c] - m) for c in range(C)]
        denom = es[0]
        for c in range(1, C):
            denom = denom + es[c]
        inv = pl.reciprocal(denom, approx=False)   # exact enough for 1e-5 tol

        zero = jnp.zeros_like(inv)
        for c in range(C):
            p = es[c] * inv
            # One select instead of building y and multiplying; padded pixels
            # carry label -1 and never match.
            inter_ref[0, c] += jnp.sum(jnp.where(lab == c, p, zero),
                                       axis=0, keepdims=True)
            psum_ref[0, c] += jnp.sum(p, axis=0, keepdims=True)

    return kernel


def _pick_tiles(rows, budget_rows):
    """Return (tile_rows, rows_pad). Prefer a no-copy layout: full extent or a
    multiple-of-8 divisor of `rows`; fall back to padding (rare, costs a copy)."""
    if rows <= budget_rows:
        return rows, rows
    start = (budget_rows // 8) * 8
    for t in range(start, 7, -8):
        if rows % t == 0:
            return t, rows
    t = start
    return t, ((rows + t - 1) // t) * t


def soft_dice_loss(digits, y_true, smooth=SMOOTH, max_vmem_bytes=12 * 1024 * 1024):
    """digits, y_true: (N, C, H, W); y_true one-hot. Returns scalar f32 loss."""
    assert digits.shape == y_true.shape
    N, C, H, W = digits.shape
    assert C >= 2, "dice[:, 1:] needs at least 2 channels (matches the reference)"
    hw = H * W
    rows = (hw + _LANES - 1) // _LANES

    # ---- XLA side-pass over y_true (single fused read): labels + class counts.
    labels = jnp.argmax(y_true, axis=1).astype(jnp.int32)          # (N, H, W)
    y_sum = jnp.sum(y_true, axis=(2, 3)).astype(jnp.float32)       # (N, C)

    # ---- VMEM budget: 2x double-buffered inputs + f32 intermediates per row.
    x_item = jnp.dtype(digits.dtype).itemsize
    in_row = C * _LANES * x_item + _LANES * 4                      # digits + labels
    tmp_row = (2 * C + 4) * _LANES * 4                             # xs, es, m, denom, p, sel
    per_row = 2 * in_row + tmp_row
    budget_rows = max(8, (max_vmem_bytes // per_row) // 8 * 8)
    tile_rows, rows_pad = _pick_tiles(rows, budget_rows)
    num_t = rows_pad // tile_rows

    # v7x megacore: split the spatial reduction into P partial accumulators so
    # both TensorCores have work even when N == 1. Harmless on v5e/v6e.
    P = 2 if (num_t >= 2 and num_t % 2 == 0) else 1
    T = num_t // P

    # ---- Layout: (N, C, rows_pad, 128). Free reshape when no padding needed.
    dig3 = digits.reshape(N, C, hw)
    lab2 = labels.reshape(N, hw)
    pad_count = rows_pad * _LANES - hw
    if pad_count:
        # TODO(synk): rare fallback pad copies digits once; pad upstream (or keep
        # H*W a multiple of 128) to stay fully copy-free.
        dig3 = jnp.pad(dig3, ((0, 0), (0, 0), (0, pad_count)))
        lab2 = jnp.pad(lab2, ((0, 0), (0, pad_count)), constant_values=-1)
    dig4 = dig3.reshape(N, C, rows_pad, _LANES)
    lab3 = lab2.reshape(N, rows_pad, _LANES)

    in_dig_spec = pl.BlockSpec((1, C, tile_rows, _LANES),
                               lambda n, p, t: (n, 0, p * T + t, 0))
    in_lab_spec = pl.BlockSpec((1, tile_rows, _LANES),
                               lambda n, p, t: (n, p * T + t, 0))
    # Constant block index along t -> output stays resident in VMEM across the
    # spatial reduction axis and serves as the accumulator.
    out_spec = pl.BlockSpec((1, C, 1, _LANES),
                            lambda n, p, t: (n * P + p, 0, 0, 0))

    cost = pl.CostEstimate(
        flops=int(6 * N * C * hw),
        transcendentals=int(N * C * hw),
        bytes_accessed=int(N * C * rows_pad * _LANES * x_item
                           + N * rows_pad * _LANES * 4
                           + 2 * N * P * C * _LANES * 4))

    inter_p, psum_p = pl.pallas_call(
        _make_kernel(C),
        out_shape=(
            jax.ShapeDtypeStruct((N * P, C, 1, _LANES), jnp.float32),
            jax.ShapeDtypeStruct((N * P, C, 1, _LANES), jnp.float32),
        ),
        grid_spec=pltpu.PrefetchScalarGridSpec(
            num_scalar_prefetch=0,
            grid=(N, P, T),
            in_specs=[in_dig_spec, in_lab_spec],
            out_specs=[out_spec, out_spec],
        ),
        compiler_params=pltpu.CompilerParams(
            # batch + partial axes independent -> parallel (megacore-shardable);
            # spatial-tile axis is the reduction -> arbitrary, last in grid.
            dimension_semantics=("parallel", "parallel", "arbitrary")),
        cost_estimate=cost,
    )(dig4, lab3)

    # ---- Tiny XLA epilogue: collapse partials + lanes, pad correction, dice.
    inter = inter_p.reshape(N, P, C, _LANES).sum(axis=(1, 3))       # (N, C)
    psum = psum_p.reshape(N, P, C, _LANES).sum(axis=(1, 3))         # (N, C)
    if pad_count:
        # Zero-padded digits contribute exactly pad_count/C per channel to psum.
        psum = psum - (pad_count / C)
    union = psum + y_sum + smooth
    dice = 2.0 * (inter + smooth) / union
    return 1.0 - dice[:, 1:].mean()


def _reference(digits, y_true, smooth=SMOOTH):
    p = jax.nn.softmax(digits, axis=1)
    inter = jnp.sum(p * y_true, axis=(2, 3)) + smooth
    union = p.sum(axis=(2, 3)) + y_true.sum(axis=(2, 3)) + smooth
    dice = 2 * inter / union
    return 1 - dice[:, 1:].mean()


if __name__ == "__main__":
    key = jax.random.PRNGKey(0)
    k1, k2 = jax.random.split(key)

    N, C, H, W = 2, 4, 16, 16
    digits = jax.random.normal(k1, (N, C, H, W), dtype=jnp.float32)
    labels = jax.random.randint(k2, (N, H, W), 0, C)
    y_true = jax.nn.one_hot(labels, C, axis=1, dtype=jnp.float32)  # (N, C, H, W)

    loss = jax.block_until_ready(soft_dice_loss(digits, y_true))
    ref = jax.block_until_ready(_reference(digits, y_true))
    np.testing.assert_allclose(np.asarray(loss), np.asarray(ref),
                               rtol=1e-5, atol=1e-5)
    print("KERNEL_OK")
</pallas_src>

<mosaic_0001>
module attributes {stable_mosaic.version = 11 : i64} {
  func.func @kernel(%arg0: i32, %arg1: i32, %arg2: i32, %arg3: memref<1x4x2x128xf32, #tpu.memory_space<vmem>>, %arg4: memref<1x2x128xi32, #tpu.memory_space<vmem>>, %arg5: memref<1x4x1x128xf32, #tpu.memory_space<vmem>>, %arg6: memref<1x4x1x128xf32, #tpu.memory_space<vmem>>) attributes {dimension_semantics = [#tpu.dimension_semantics<parallel>, #tpu.dimension_semantics<parallel>, #tpu.dimension_semantics<arbitrary>], iteration_bounds = array<i64: 2, 1, 1>, scalar_prefetch = 0 : i64, scratch_operands = 0 : i64, tpu.core_type = #tpu.core_type<tc>, window_params = [{transform_indices = @transform_0, window_bounds = array<i64: 1, 4, 2, 128>}, {transform_indices = @transform_1, window_bounds = array<i64: 1, 2, 128>}, {transform_indices = @transform_2, window_bounds = array<i64: 1, 4, 1, 128>}, {transform_indices = @transform_3, window_bounds = array<i64: 1, 4, 1, 128>}]} {
    %c0_i32 = arith.constant 0 : i32
    %0 = arith.cmpi eq, %arg2, %c0_i32 : i32
    %1 = arith.extui %0 : i1 to i32
    %c0_i32_0 = arith.constant 0 : i32
    %2 = arith.cmpi ne, %1, %c0_i32_0 : i32
    scf.if %2 {
      %cst_89 = arith.constant 0.000000e+00 : f32
      %109 = vector.broadcast %cst_89 : f32 to vector<1x4x1x128xf32>
      %c0_90 = arith.constant 0 : index
      %c0_91 = arith.constant 0 : index
      %c0_92 = arith.constant 0 : index
      %c0_93 = arith.constant 0 : index
      %110 = vector.load %arg5[%c0_90, %c0_91, %c0_92, %c0_93] : memref<1x4x1x128xf32, #tpu.memory_space<vmem>>, vector<1x4x1x128xf32>
      tpu.vector_store %arg5[%c0_90, %c0_91, %c0_92, %c0_93], %109 {strides = array<i32>} : memref<1x4x1x128xf32, #tpu.memory_space<vmem>>, vector<1x4x1x128xf32>,
      %cst_94 = arith.constant 0.000000e+00 : f32
      %111 = vector.broadcast %cst_94 : f32 to vector<1x4x1x128xf32>
      %c0_95 = arith.constant 0 : index
      %c0_96 = arith.constant 0 : index
      %c0_97 = arith.constant 0 : index
      %c0_98 = arith.constant 0 : index
      %112 = vector.load %arg6[%c0_95, %c0_96, %c0_97, %c0_98] : memref<1x4x1x128xf32, #tpu.memory_space<vmem>>, vector<1x4x1x128xf32>
      tpu.vector_store %arg6[%c0_95, %c0_96, %c0_97, %c0_98], %111 {strides = array<i32>} : memref<1x4x1x128xf32, #tpu.memory_space<vmem>>, vector<1x4x1x128xf32>,
    } else {
    }
    %c0 = arith.constant 0 : index
    %c0_1 = arith.constant 0 : index
    %c0_2 = arith.constant 0 : index
    %3 = vector.load %arg4[%c0, %c0_1, %c0_2] : memref<1x2x128xi32, #tpu.memory_space<vmem>>, vector<1x2x128xi32>
    %4 = vector.shape_cast %3 : vector<1x2x128xi32> to vector<2x128xi32>
    %c0_3 = arith.constant 0 : index
    %c0_4 = arith.constant 0 : index
    %c0_5 = arith.constant 0 : index
    %c0_6 = arith.constant 0 : index
    %5 = vector.load %arg3[%c0_3, %c0_4, %c0_5, %c0_6] : memref<1x4x2x128xf32, #tpu.memory_space<vmem>>, vector<1x1x2x128xf32>
    %6 = vector.shape_cast %5 : vector<1x1x2x128xf32> to vector<2x128xf32>
    %c0_7 = arith.constant 0 : index
    %c1 = arith.constant 1 : index
    %c0_8 = arith.constant 0 : index
    %c0_9 = arith.constant 0 : index
    %7 = vector.load %arg3[%c0_7, %c1, %c0_8, %c0_9] : memref<1x4x2x128xf32, #tpu.memory_space<vmem>>, vector<1x1x2x128xf32>
    %8 = vector.shape_cast %7 : vector<1x1x2x128xf32> to vector<2x128xf32>
    %c0_10 = arith.constant 0 : index
    %c2 = arith.constant 2 : index
    %c0_11 = arith.constant 0 : index
    %c0_12 = arith.constant 0 : index
    %9 = vector.load %arg3[%c0_10, %c2, %c0_11, %c0_12] : memref<1x4x2x128xf32, #tpu.memory_space<vmem>>, vector<1x1x2x128xf32>
    %10 = vector.shape_cast %9 : vector<1x1x2x128xf32> to vector<2x128xf32>
    %c0_13 = arith.constant 0 : index
    %c3 = arith.constant 3 : index
    %c0_14 = arith.constant 0 : index
    %c0_15 = arith.constant 0 : index
    %11 = vector.load %arg3[%c0_13, %c3, %c0_14, %c0_15] : memref<1x4x2x128xf32, #tpu.memory_space<vmem>>, vector<1x1x2x128xf32>
    %12 = vector.shape_cast %11 : vector<1x1x2x128xf32> to vector<2x128xf32>
    %13 = arith.maximumf %6, %8 : vector<2x128xf32>
    %14 = arith.maximumf %13, %10 : vector<2x128xf32>
    %15 = arith.maximumf %14, %12 : vector<2x128xf32>
    %16 = arith.subf %6, %15 : vector<2x128xf32>
    %17 = math.exp %16 : vector<2x128xf32>
    %18 = arith.subf %8, %15 : vector<2x128xf32>
    %19 = math.exp %18 : vector<2x128xf32>
    %20 = arith.subf %10, %15 : vector<2x128xf32>
    %21 = math.exp %20 : vector<2x128xf32>
    %22 = arith.subf %12, %15 : vector<2x128xf32>
    %23 = math.exp %22 : vector<2x128xf32>
    %24 = arith.addf %17, %19 : vector<2x128xf32>
    %25 = arith.addf %24, %21 : vector<2x128xf32>
    %26 = arith.addf %25, %23 : vector<2x128xf32>
    %27 = tpu.reciprocal %26 : vector<2x128xf32> -> vector<2x128xf32>
    %cst = arith.constant 0.000000e+00 : f32
    %28 = vector.broadcast %cst : f32 to vector<2x128xf32>
    %29 = arith.mulf %17, %27 : vector<2x128xf32>
    %c0_16 = arith.constant 0 : index
    %c0_17 = arith.constant 0 : index
    %c0_18 = arith.constant 0 : index
    %c0_19 = arith.constant 0 : index
    %30 = vector.load %arg5[%c0_16, %c0_17, %c0_18, %c0_19] : memref<1x4x1x128xf32, #tpu.memory_space<vmem>>, vector<1x1x1x128xf32>
    %31 = vector.shape_cast %30 : vector<1x1x1x128xf32> to vector<1x128xf32>
    %c0_i32_20 = arith.constant 0 : i32
    %32 = vector.broadcast %c0_i32_20 : i32 to vector<2x128xi32>
    %33 = arith.cmpi eq, %4, %32 : vector<2x128xi32>
    %34 = arith.select %33, %29, %28 : vector<2x128xi1>, vector<2x128xf32>
    %cst_21 = arith.constant dense<0.000000e+00> : vector<128xf32>
    %35 = vector.multi_reduction <add>, %34, %cst_21 [0] : vector<2x128xf32> to vector<128xf32>
    %36 = vector.shape_cast %35 : vector<128xf32> to vector<1x128xf32>
    %37 = arith.addf %31, %36 : vector<1x128xf32>
    %c0_22 = arith.constant 0 : index
    %c0_23 = arith.constant 0 : index
    %c0_24 = arith.constant 0 : index
    %c0_25 = arith.constant 0 : index
    %38 = vector.load %arg5[%c0_22, %c0_23, %c0_24, %c0_25] : memref<1x4x1x128xf32, #tpu.memory_space<vmem>>, vector<1x1x1x128xf32>
    %39 = vector.shape_cast %38 : vector<1x1x1x128xf32> to vector<1x128xf32>
    %40 = vector.shape_cast %37 : vector<1x128xf32> to vector<1x1x1x128xf32>
    tpu.vector_store %arg5[%c0_22, %c0_23, %c0_24, %c0_25], %40 {strides = array<i32>} : memref<1x4x1x128xf32, #tpu.memory_space<vmem>>, vector<1x1x1x128xf32>,
    %c0_26 = arith.constant 0 : index
    %c0_27 = arith.constant 0 : index
    %c0_28 = arith.constant 0 : index
    %c0_29 = arith.constant 0 : index
    %41 = vector.load %arg6[%c0_26, %c0_27, %c0_28, %c0_29] : memref<1x4x1x128xf32, #tpu.memory_space<vmem>>, vector<1x1x1x128xf32>
    %42 = vector.shape_cast %41 : vector<1x1x1x128xf32> to vector<1x128xf32>
    %cst_30 = arith.constant dense<0.000000e+00> : vector<128xf32>
    %43 = vector.multi_reduction <add>, %29, %cst_30 [0] : vector<2x128xf32> to vector<128xf32>
    %44 = vector.shape_cast %43 : vector<128xf32> to vector<1x128xf32>
    %45 = arith.addf %42, %44 : vector<1x128xf32>
    %c0_31 = arith.constant 0 : index
    %c0_32 = arith.constant 0 : index
    %c0_33 = arith.constant 0 : index
    %c0_34 = arith.constant 0 : index
    %46 = vector.load %arg6[%c0_31, %c0_32, %c0_33, %c0_34] : memref<1x4x1x128xf32, #tpu.memory_space<vmem>>, vector<1x1x1x128xf32>
    %47 = vector.shape_cast %46 : vector<1x1x1x128xf32> to vector<1x128xf32>
    %48 = vector.shape_cast %45 : vector<1x128xf32> to vector<1x1x1x128xf32>
    tpu.vector_store %arg6[%c0_31, %c0_32, %c0_33, %c0_34], %48 {strides = array<i32>} : memref<1x4x1x128xf32, #tpu.memory_space<vmem>>, vector<1x1x1x128xf32>,
    %49 = arith.mulf %19, %27 : vector<2x128xf32>
    %c0_35 = arith.constant 0 : index
    %c1_36 = arith.constant 1 : index
    %c0_37 = arith.constant 0 : index
    %c0_38 = arith.constant 0 : index
    %50 = vector.load %arg5[%c0_35, %c1_36, %c0_37, %c0_38] : memref<1x4x1x128xf32, #tpu.memory_space<vmem>>, vector<1x1x1x128xf32>
    %51 = vector.shape_cast %50 : vector<1x1x1x128xf32> to vector<1x128xf32>
    %c1_i32 = arith.constant 1 : i32
    %52 = vector.broadcast %c1_i32 : i32 to vector<2x128xi32>
    %53 = arith.cmpi eq, %4, %52 : vector<2x128xi32>
    %54 = arith.select %53, %49, %28 : vector<2x128xi1>, vector<2x128xf32>
    %cst_39 = arith.constant dense<0.000000e+00> : vector<128xf32>
    %55 = vector.multi_reduction <add>, %54, %cst_39 [0] : vector<2x128xf32> to vector<128xf32>
    %56 = vector.shape_cast %55 : vector<128xf32> to vector<1x128xf32>
    %57 = arith.addf %51, %56 : vector<1x128xf32>
    %c0_40 = arith.constant 0 : index
    %c1_41 = arith.constant 1 : index
    %c0_42 = arith.constant 0 : index
    %c0_43 = arith.constant 0 : index
    %58 = vector.load %arg5[%c0_40, %c1_41, %c0_42, %c0_43] : memref<1x4x1x128xf32, #tpu.memory_space<vmem>>, vector<1x1x1x128xf32>
    %59 = vector.shape_cast %58 : vector<1x1x1x128xf32> to vector<1x128xf32>
    %60 = vector.shape_cast %57 : vector<1x128xf32> to vector<1x1x1x128xf32>
    tpu.vector_store %arg5[%c0_40, %c1_41, %c0_42, %c0_43], %60 {strides = array<i32>} : memref<1x4x1x128xf32, #tpu.memory_space<vmem>>, vector<1x1x1x128xf32>,
    %c0_44 = arith.constant 0 : index
    %c1_45 = arith.constant 1 : index
    %c0_46 = arith.constant 0 : index
    %c0_47 = arith.constant 0 : index
    %61 = vector.load %arg6[%c0_44, %c1_45, %c0_46, %c0_47] : memref<1x4x1x128xf32, #tpu.memory_space<vmem>>, vector<1x1x1x128xf32>
    %62 = vector.shape_cast %61 : vector<1x1x1x128xf32> to vector<1x128xf32>
    %cst_48 = arith.constant dense<0.000000e+00> : vector<128xf32>
    %63 = vector.multi_reduction <add>, %49, %cst_48 [0] : vector<2x128xf32> to vector<128xf32>
    %64 = vector.shape_cast %63 : vector<128xf32> to vector<1x128xf32>
    %65 = arith.addf %62, %64 : vector<1x128xf32>
    %c0_49 = arith.constant 0 : index
    %c1_50 = arith.constant 1 : index
    %c0_51 = arith.constant 0 : index
    %c0_52 = arith.constant 0 : index
    %66 = vector.load %arg6[%c0_49, %c1_50, %c0_51, %c0_52] : memref<1x4x1x128xf32, #tpu.memory_space<vmem>>, vector<1x1x1x128xf32>
    %67 = vector.shape_cast %66 : vector<1x1x1x128xf32> to vector<1x128xf32>
    %68 = vector.shape_cast %65 : vector<1x128xf32> to vector<1x1x1x128xf32>
    tpu.vector_store %arg6[%c0_49, %c1_50, %c0_51, %c0_52], %68 {strides = array<i32>} : memref<1x4x1x128xf32, #tpu.memory_space<vmem>>, vector<1x1x1x128xf32>,
    %69 = arith.mulf %21, %27 : vector<2x128xf32>
    %c0_53 = arith.constant 0 : index
    %c2_54 = arith.constant 2 : index
    %c0_55 = arith.constant 0 : index
    %c0_56 = arith.constant 0 : index
    %70 = vector.load %arg5[%c0_53, %c2_54, %c0_55, %c0_56] : memref<1x4x1x128xf32, #tpu.memory_space<vmem>>, vector<1x1x1x128xf32>
    %71 = vector.shape_cast %70 : vector<1x1x1x128xf32> to vector<1x128xf32>
    %c2_i32 = arith.constant 2 : i32
    %72 = vector.broadcast %c2_i32 : i32 to vector<2x128xi32>
    %73 = arith.cmpi eq, %4, %72 : vector<2x128xi32>
    %74 = arith.select %73, %69, %28 : vector<2x128xi1>, vector<2x128xf32>
    %cst_57 = arith.constant dense<0.000000e+00> : vector<128xf32>
    %75 = vector.multi_reduction <add>, %74, %cst_57 [0] : vector<2x128xf32> to vector<128xf32>
    %76 = vector.shape_cast %75 : vector<128xf32> to vector<1x128xf32>
    %77 = arith.addf %71, %76 : vector<1x128xf32>
    %c0_58 = arith.constant 0 : index
    %c2_59 = arith.constant 2 : index
    %c0_60 = arith.constant 0 : index
    %c0_61 = arith.constant 0 : index
    %78 = vector.load %arg5[%c0_58, %c2_59, %c0_60, %c0_61] : memref<1x4x1x128xf32, #tpu.memory_space<vmem>>, vector<1x1x1x128xf32>
    %79 = vector.shape_cast %78 : vector<1x1x1x128xf32> to vector<1x128xf32>
    %80 = vector.shape_cast %77 : vector<1x128xf32> to vector<1x1x1x128xf32>
    tpu.vector_store %arg5[%c0_58, %c2_59, %c0_60, %c0_61], %80 {strides = array<i32>} : memref<1x4x1x128xf32, #tpu.memory_space<vmem>>, vector<1x1x1x128xf32>,
    %c0_62 = arith.constant 0 : index
    %c2_63 = arith.constant 2 : index
    %c0_64 = arith.constant 0 : index
    %c0_65 = arith.constant 0 : index
    %81 = vector.load %arg6[%c0_62, %c2_63, %c0_64, %c0_65] : memref<1x4x1x128xf32, #tpu.memory_space<vmem>>, vector<1x1x1x128xf32>
    %82 = vector.shape_cast %81 : vector<1x1x1x128xf32> to vector<1x128xf32>
    %cst_66 = arith.constant dense<0.000000e+00> : vector<128xf32>
    %83 = vector.multi_reduction <add>, %69, %cst_66 [0] : vector<2x128xf32> to vector<128xf32>
    %84 = vector.shape_cast %83 : vector<128xf32> to vector<1x128xf32>
    %85 = arith.addf %82, %84 : vector<1x128xf32>
    %c0_67 = arith.constant 0 : index
    %c2_68 = arith.constant 2 : index
    %c0_69 = arith.constant 0 : index
    %c0_70 = arith.constant 0 : index
    %86 = vector.load %arg6[%c0_67, %c2_68, %c0_69, %c0_70] : memref<1x4x1x128xf32, #tpu.memory_space<vmem>>, vector<1x1x1x128xf32>
    %87 = vector.shape_cast %86 : vector<1x1x1x128xf32> to vector<1x128xf32>
    %88 = vector.shape_cast %85 : vector<1x128xf32> to vector<1x1x1x128xf32>
    tpu.vector_store %arg6[%c0_67, %c2_68, %c0_69, %c0_70], %88 {strides = array<i32>} : memref<1x4x1x128xf32, #tpu.memory_space<vmem>>, vector<1x1x1x128xf32>,
    %89 = arith.mulf %23, %27 : vector<2x128xf32>
    %c0_71 = arith.constant 0 : index
    %c3_72 = arith.constant 3 : index
    %c0_73 = arith.constant 0 : index
    %c0_74 = arith.constant 0 : index
    %90 = vector.load %arg5[%c0_71, %c3_72, %c0_73, %c0_74] : memref<1x4x1x128xf32, #tpu.memory_space<vmem>>, vector<1x1x1x128xf32>
    %91 = vector.shape_cast %90 : vector<1x1x1x128xf32> to vector<1x128xf32>
    %c3_i32 = arith.constant 3 : i32
    %92 = vector.broadcast %c3_i32 : i32 to vector<2x128xi32>
    %93 = arith.cmpi eq, %4, %92 : vector<2x128xi32>
    %94 = arith.select %93, %89, %28 : vector<2x128xi1>, vector<2x128xf32>
    %cst_75 = arith.constant dense<0.000000e+00> : vector<128xf32>
    %95 = vector.multi_reduction <add>, %94, %cst_75 [0] : vector<2x128xf32> to vector<128xf32>
    %96 = vector.shape_cast %95 : vector<128xf32> to vector<1x128xf32>
    %97 = arith.addf %91, %96 : vector<1x128xf32>
    %c0_76 = arith.constant 0 : index
    %c3_77 = arith.constant 3 : index
    %c0_78 = arith.constant 0 : index
    %c0_79 = arith.constant 0 : index
    %98 = vector.load %arg5[%c0_76, %c3_77, %c0_78, %c0_79] : memref<1x4x1x128xf32, #tpu.memory_space<vmem>>, vector<1x1x1x128xf32>
    %99 = vector.shape_cast %98 : vector<1x1x1x128xf32> to vector<1x128xf32>
    %100 = vector.shape_cast %97 : vector<1x128xf32> to vector<1x1x1x128xf32>
    tpu.vector_store %arg5[%c0_76, %c3_77, %c0_78, %c0_79], %100 {strides = array<i32>} : memref<1x4x1x128xf32, #tpu.memory_space<vmem>>, vector<1x1x1x128xf32>,
    %c0_80 = arith.constant 0 : index
    %c3_81 = arith.constant 3 : index
    %c0_82 = arith.constant 0 : index
    %c0_83 = arith.constant 0 : index
    %101 = vector.load %arg6[%c0_80, %c3_81, %c0_82, %c0_83] : memref<1x4x1x128xf32, #tpu.memory_space<vmem>>, vector<1x1x1x128xf32>
    %102 = vector.shape_cast %101 : vector<1x1x1x128xf32> to vector<1x128xf32>
    %cst_84 = arith.constant dense<0.000000e+00> : vector<128xf32>
    %103 = vector.multi_reduction <add>, %89, %cst_84 [0] : vector<2x128xf32> to vector<128xf32>
    %104 = vector.shape_cast %103 : vector<128xf32> to vector<1x128xf32>
    %105 = arith.addf %102, %104 : vector<1x128xf32>
    %c0_85 = arith.constant 0 : index
    %c3_86 = arith.constant 3 : index
    %c0_87 = arith.constant 0 : index
    %c0_88 = arith.constant 0 : index
    %106 = vector.load %arg6[%c0_85, %c3_86, %c0_87, %c0_88] : memref<1x4x1x128xf32, #tpu.memory_space<vmem>>, vector<1x1x1x128xf32>
    %107 = vector.shape_cast %106 : vector<1x1x1x128xf32> to vector<1x128xf32>
    %108 = vector.shape_cast %105 : vector<1x128xf32> to vector<1x1x1x128xf32>
    tpu.vector_store %arg6[%c0_85, %c3_86, %c0_87, %c0_88], %108 {strides = array<i32>} : memref<1x4x1x128xf32, #tpu.memory_space<vmem>>, vector<1x1x1x128xf32>,
    return
  }
  func.func @transform_0(%arg0: i32, %arg1: i32, %arg2: i32) -> (i32, i32, i32, i32) {
    %c1_i32 = arith.constant 1 : i32
    %0 = arith.muli %arg1, %c1_i32 : i32
    %1 = arith.addi %0, %arg2 : i32
    %c0_i32 = arith.constant 0 : i32
    %c0_i32_0 = arith.constant 0 : i32
    %c0_i32_1 = arith.constant 0 : i32
    return %arg0, %c0_i32, %1, %c0_i32_0 : i32, i32, i32, i32
  }
  func.func @transform_1(%arg0: i32, %arg1: i32, %arg2: i32) -> (i32, i32, i32) {
    %c1_i32 = arith.constant 1 : i32
    %0 = arith.muli %arg1, %c1_i32 : i32
    %1 = arith.addi %0, %arg2 : i32
    %c0_i32 = arith.constant 0 : i32
    %c0_i32_0 = arith.constant 0 : i32
    return %arg0, %1, %c0_i32 : i32, i32, i32
  }
  func.func @transform_2(%arg0: i32, %arg1: i32, %arg2: i32) -> (i32, i32, i32, i32) {
    %c1_i32 = arith.constant 1 : i32
    %0 = arith.muli %arg0, %c1_i32 : i32
    %1 = arith.addi %0, %arg1 : i32
    %c0_i32 = arith.constant 0 : i32
    %c0_i32_0 = arith.constant 0 : i32
    %c0_i32_1 = arith.constant 0 : i32
    %c0_i32_2 = arith.constant 0 : i32
    return %1, %c0_i32, %c0_i32_0, %c0_i32_1 : i32, i32, i32, i32
  }
  func.func @transform_3(%arg0: i32, %arg1: i32, %arg2: i32) -> (i32, i32, i32, i32) {
    %c1_i32 = arith.constant 1 : i32
    %0 = arith.muli %arg0, %c1_i32 : i32
    %1 = arith.addi %0, %arg1 : i32
    %c0_i32 = arith.constant 0 : i32
    %c0_i32_0 = arith.constant 0 : i32
    %c0_i32_1 = arith.constant 0 : i32
    %c0_i32_2 = arith.constant 0 : i32
    return %1, %c0_i32, %c0_i32_0, %c0_i32_1 : i32, i32, i32, i32
  }
}

</mosaic_0001>

<bundles_post_ra>
// kernel: tpu_custom_call.1
= control target key start
LH: loop header
LB: loop body
LE: loop exit
PB: predicated region body
PF: predicated region fallthrough
CT: control target
= control target key end

     0   :  { %9 = vsyncpa [#allocation3], 0  ;;  %s1230_s0 = inlined_call_operand.hbm [shape: f32[2,4,2,128], index: 0, kind: input, shape index: {}]   ;;  %s1231_s1 = inlined_call_operand.hbm [shape: s32[2,2,128], index: 1, kind: input, shape index: {}]   ;;  %s1232_s2 = inlined_call_operand.hbm [shape: f32[2,4,1,128], index: 2, kind: output, shape index: {0}]   ;;  %s1233_s3 = inlined_call_operand.hbm [shape: f32[2,4,1,128], index: 3, kind: output, shape index: {1}]  }
   0x1   :  { %11 = vsyncpa [#allocation3 + $0x1], 0 }
   0x2   :  { %12 = vsyncpa [#allocation6], 0 }
   0x3   :  { %14 = vsyncpa [#allocation6 + $0x1], 0 }
   0x4   :  { %15 = vsyncpa [#allocation4], 0 }
   0x5   :  { %17 = vsyncpa [#allocation4 + $0x1], 0 }
   0x6   :  { %18 = vsyncpa [#allocation9], 0 }
   0x7   :  { %20 = vsyncpa [#allocation9 + $0x1], 0  ;;  %s933_s12 = smov 0   ;;  %s935_s13 = smov 0  }
   0x8   :  { %s937_s14 = smov 0   ;;  %s939_s15 = smov 0  }
   0x9   :  { %s941_s16 = smov 0   ;;  %s943_s17 = smov 0  }
   0xa LB: > { %s597_s18 = sadd.s32 4294967295, %s902_s17   ;;  %s598_s19 = sadd.s32 4294967294, %s902_s17   ;;  %s902_s17 = sphi %s943_s17, %s26_s17   ;;  %s898_s16 = sphi %s941_s16, %s1252_s16   ;;  %s894_s15 = sphi %s939_s15, %s1251_s15   ;;  %s890_s14 = sphi %s937_s14, %s1250_s14   ;;  %s886_s13 = sphi %s935_s13, %s1249_s13   ;;  %s882_s12 = sphi %s933_s12, %s1248_s12  }
   0xb   : > { %s45_s20 = sadd.s32 1, %s898_s16  ;;  %s56_s21 = sadd.s32 1, %s890_s14 }
   0xc   : > { %p47_p0 = scmp.ge.s32.totalorder %s45_s20, 2  ;;  %p63_p1 = scmp.ne.s32.totalorder %s890_s14, %s886_s13 }
   0xd   : > { %p64_p2 = scmp.eq.s32.totalorder %s902_s17, 0  ;;  %p69_p3 = scmp.ne.s32.totalorder %s886_s13, %s882_s12 }
   0xe   : > { %s1254_s20 = smov (%p47_p0, %s45_s20), 0  ;;  %p70_p5 = scmp.eq.s32.totalorder %s597_s18, 0 }
   0xf   : > { %p974_p4 = por %p64_p2, %p63_p1  ;;  %s51_s23 = ssub.s32 %s898_s16, %s1254_s20 }
  0x10   : > { %p125_p6 = scmp.eq.s32.totalorder %s597_s18, 1  ;;  %p54_p7 = scmp.eq.s32.totalorder %s51_s23, 0 }
  0x11   : > { %p980_p8 = por %p70_p5, %p69_p3  ;;  %p131_p10 = scmp.eq.s32.totalorder %s598_s19, 1 }
  0x12   : > { %p984_p9 = por %p125_p6, %p63_p1  ;;  %p659_p13 = scmp.lt.s32.totalorder %s902_s17, 2 }
  0x13   : > { %s1237_s24 = scalar_select %p980_p8, 1, 0 }
  0x14   : > { %s1238_s25 = scalar_select %p984_p9, 1, 0 }
  0x15   : > { %s989_s26 = scalar_select %p54_p7, %s890_s14, %s56_s21  }
  0x16   : > { %p991_p11 = por %p131_p10, %p69_p3  ;;  %s998_s28 = sand.u32 1, %s890_s14  }
  0x17   : > { %s601_s29 = sshll.u32 %s998_s28, 3  ;;  %s634_s30 = sshll.u32 %s898_s16, 7 }
  0x18   : > { %s1239_s27 = scalar_select %p991_p11, 1, 0 }
  0x19   : > { %s1005_s6 = scalar_lea.hbm %s1230_s0, %s634_s30  ;;  %s183_s7 = scalar_lea.vmem [#allocation2], %s601_s29 }
  0x1a   : > { %s192_s8 = sshll.u32 %s183_s7, 4  ;;  %p1011_p0 = pnand %p659_p13, %p974_p4  ;;  %s1007_s8 = int_to_ptr.vmem [resolvable:$true] %s192_s8 }
  0x1b   : > { %s180_s10 = scalar_lea.sflag [#allocation3], %s998_s28  ;;  %s724_s11 = scalar_lea.hbm %s1005_s6, 128 }
  0x1c   : > { %p725_p2 = scmp.ne.s32.totalorder %s1005_s6, %s724_s11  ;;  %p726_p3 = pneg %p1011_p0 }
  0x1d   : > { %s729_s21 = scalar_lea.hbm %s1230_s0, 256  ;;  %p730_p4 = scmp.lt.u32.totalorder %s1005_s6, %s1230_s0 }
  0x1e   : > { %p727_p5 = pnand %p726_p3, %p725_p2  ;;  %p731_p7 = scmp.lt.u32.totalorder %s729_s21, %s724_s11 }
  0x1f   : > { %p733_p13 = scmp.lt.u32.totalorder %s724_s11, %s1005_s6 }
  0x20   : > { %p728_p6 = pneg %p727_p5  ;;  %p732_p10 = por %p731_p7, %p730_p4 }
  0x22   : > { %p734_p12 = por %p733_p13, %p732_p10 }
  0x24   : > { %p735_p1 = pnand %p734_p12, %p728_p6 }
  0x26   : > { %738 = shalt.err (!%p735_p1)
}
  0x27   : > { %s739_s29 = scalar_lea.vmem %s1007_s8, 128  ;;  %s904_s30 = smov [#allocation2]  }
  0x28   : > { %p740_p2 = scmp.ne.s32.totalorder %s1007_s8, %s739_s29  ;;  %s744_s4 = sshll.u32 %s904_s30, 4  ;;  %s745_s4 = int_to_ptr.vmem [resolvable:$false] %s744_s4 }
  0x29   : > { %s746_s5 = scalar_lea.vmem %s745_s4, 256  ;;  %p747_p9 = scmp.lt.s32.totalorder %s1007_s8, %s745_s4 }
  0x2a   : > { %p742_p5 = pnand %p740_p2, %p726_p3  ;;  %p748_p4 = scmp.lt.s32.totalorder %s746_s5, %s739_s29 }
  0x2c   : > { %p743_p11 = pneg %p742_p5  ;;  %p749_p7 = por %p748_p4, %p747_p9 }
  0x2e   : > { %p750_p10 = pnand %p749_p7, %p743_p11 }
  0x30   : > { %753 = shalt.err (!%p750_p10)
}
  0x31   : > { %s905_s7 = smov 32   ;;  %s906_s11 = smov 2  }
  0x32   : > { %648 = dma.hbm_to_vmem [thread:$0]  (!%p1011_p0), %s1005_s6, 128, %s1007_s8, %s180_s10, %s905_s7, %s905_s7, %s906_s11  }
  0x33   : > { %p220_p12 = scmp.lt.s32.totalorder %s902_s17, 3  ;;  %s604_s18 = sshll.u32 %s998_s28, 1 }
  0x34   : > { %s605_s19 = sshll.u32 %s898_s16, 5  ;;  %p1241_p9 = scmp.ge.s32.totalorder %s902_s17, 1 }
  0x35   : > { %s1056_s29 = scalar_lea.hbm %s1231_s1, %s605_s19  ;;  %s206_s30 = scalar_lea.vmem [#allocation5], %s604_s18 }
  0x36   : > { %p1049_p11 = pnand %p1241_p9, %p220_p12  ;;  %s215_s4 = sshll.u32 %s206_s30, 4  ;;  %s216_s4 = int_to_ptr.vmem [resolvable:$true] %s215_s4 }
  0x37   : > { %s203_s6 = scalar_lea.sflag [#allocation6], %s998_s28  ;;  %s754_s8 = scalar_lea.hbm %s1056_s29, 32 }
  0x38   : > { %s1242_s21 = scalar_select %p1049_p11, 1, 0 }
  0x39   : > { %p755_p1 = scmp.ne.s32.totalorder %s1056_s29, %s754_s8  ;;  %s759_s7 = scalar_lea.hbm %s1231_s1, 64 }
  0x3a   : > { %p760_p2 = scmp.lt.u32.totalorder %s1056_s29, %s1231_s1  ;;  %p761_p5 = scmp.lt.u32.totalorder %s759_s7, %s754_s8 }
  0x3b   : > { %p757_p6 = pnand %p755_p1, %p726_p3  ;;  %p763_p7 = scmp.lt.u32.totalorder %s754_s8, %s1056_s29 }
  0x3c   : > { %p762_p4 = por %p761_p5, %p760_p2 }
  0x3d   : > { %p758_p13 = pneg %p757_p6 }
  0x3e   : > { %p764_p10 = por %p763_p7, %p762_p4 }
  0x40   : > { %p765_p12 = pnand %p764_p10, %p758_p13 }
  0x42   : > { %768 = shalt.err (!%p765_p12)
}
  0x43   : > { %s769_s28 = scalar_lea.vmem %s216_s4, 32  ;;  %s907_s18 = smov [#allocation5]  }
  0x44   : > { %p770_p9 = scmp.ne.s32.totalorder %s216_s4, %s769_s28  ;;  %s774_s22 = sshll.u32 %s907_s18, 4  ;;  %s775_s22 = int_to_ptr.vmem [resolvable:$false] %s774_s22 }
  0x45   : > { %s776_s23 = scalar_lea.vmem %s775_s22, 64  ;;  %p777_p8 = scmp.lt.s32.totalorder %s216_s4, %s775_s22 }
  0x46   : > { %p772_p1 = pnand %p770_p9, %p726_p3  ;;  %p778_p11 = scmp.lt.s32.totalorder %s776_s23, %s769_s28 }
  0x48   : > { %p773_p6 = pneg %p772_p1  ;;  %p779_p2 = por %p778_p11, %p777_p8 }
  0x4a   : > { %p780_p5 = pnand %p779_p2, %p773_p6 }
  0x4c   : > { %783 = shalt.err (!%p780_p5)
}
  0x4d   : > { %651 = dma.hbm_to_vmem [thread:$0]  (!%p1011_p0), %s1056_s29, 32, %s216_s4, %s203_s6  }
  0x4e   : > { %p1243_p13 = scmp.ne.s32.totalorder %s1242_s21, 0 }
  0x4f   : > { %s1081_s30 = sand.u32 (!%p1243_p13), 1, %s886_s13   ;;  %p1244_p3 = scmp.ne.s32.totalorder (!%p1243_p13), %s1237_s24, 0 }
  0x50   : > { %224 = sbr.rel (%p1243_p13) target bundleno = 193 (0xc1), region = 28  ;;  %s607_s8 = sshll.u32 (!%p1243_p13), %s1081_s30, 3 }
  0x51   : > { %s227_s10 = scalar_lea.sflag (!%p1243_p13), [#allocation3], %s1081_s30  ;;  %s230_s5 = scalar_lea.vmem (!%p1243_p13), [#allocation2], %s607_s8 }
  0x57   : > { %865 = dma.done.wait (%p1244_p3), %s227_s10, 128  }
  0x58   : > { %867 = vsyncadd (%p1244_p3), %s227_s10, 4294967168  ;;  %s608_s9 = sshll.u32 %s1081_s30, 1  ;;  %s236_s21 = scalar_lea.sflag [#allocation6], %s1081_s30 }
  0x59   : > { %s1091_s29 = scalar_lea.vmem [#allocation5], %s608_s9 }
  0x5a   : > { %869 = dma.done.wait (%p1244_p3), %s236_s21, 32  }
  0x5b   : > { %871 = vsyncadd (%p1244_p3), %s236_s21, 4294967264  ;;  %s609_s4 = sshll.u32 %s1081_s30, 2  ;;  %v908_v0 = vmov 0.0   ;;  %v289_v1 = vld [vmem:[%s230_s5] sm:$0x3]  ;;  %vm319_vm1 = vcmask 1041408  }
  0x5c   : > { %s1098_s6 = scalar_lea.vmem [#allocation7], %s609_s4  ;;  %s1104_s7 = scalar_lea.vmem [#allocation8], %s609_s4  ;;  %v611_v2 = vld [vmem:[%s230_s5 + $0x2] sm:$0x3]  ;;  %v612_v3 = vld [vmem:[%s230_s5 + $0x4] sm:$0x3] }
  0x5d   : > { %280 = vst [vmem:[%s1098_s6] sm:$0x1] %v908_v0  ;;  %281 = vst [vmem:[%s1098_s6 + $0x1] sm:$0x1] %v908_v0  ;;  %v296_v4 = vmax.f32 %v289_v1, %v611_v2  ;;  %v613_v5 = vld [vmem:[%s230_s5 + $0x6] sm:$0x3]  ;;  %s635_s24 = sshll.u32 %s894_s15, 6 }
  0x5e   : > { %282 = vst [vmem:[%s1098_s6 + $0x2] sm:$0x1] %v908_v0  ;;  %283 = vst [vmem:[%s1098_s6 + $0x3] sm:$0x1] %v908_v0  ;;  %v288_v23 = vld [vmem:[%s1091_s29] sm:$0x3]  ;;  %s1136_s28 = scalar_lea.hbm %s1232_s2, %s635_s24  ;;  %s1148_s8 = scalar_lea.hbm %s1233_s3, %s635_s24 }
  0x5f   : > { %284 = vst [vmem:[%s1104_s7] sm:$0x1] %v908_v0  ;;  %285 = vst [vmem:[%s1104_s7 + $0x1] sm:$0x1] %v908_v0  ;;  %v297_v6 = vmax.f32 %v296_v4, %v612_v3  ;;  %vm317_vm0 = vcmp.eq.s32.totalorder %v288_v23, 0  ;;  %vm342_vm2 = vcmp.eq.s32.totalorder %v288_v23, 1  ;;  %vm367_vm3 = vcmp.eq.s32.totalorder %v288_v23, 2 }
  0x60   : > { %286 = vst [vmem:[%s1104_s7 + $0x2] sm:$0x1] %v908_v0  ;;  %287 = vst [vmem:[%s1104_s7 + $0x3] sm:$0x1] %v908_v0  ;;  %vm392_vm4 = vcmp.eq.s32.totalorder %v288_v23, 3  ;;  %s434_s11 = sshll.u32 %s1098_s6, 4  ;;  %s1139_s11 = int_to_ptr.vmem [resolvable:$true] %s434_s11 }
  0x61   : > { %v298_v7 = vmax.f32 %v297_v6, %v613_v5  ;;  %s451_s18 = sshll.u32 %s1104_s7, 4  ;;  %s415_s10 = scalar_lea.sflag [#allocation4], %s1081_s30  ;;  %s1150_s18 = int_to_ptr.vmem [resolvable:$true] %s451_s18 }
  0x62   : > { %s784_s5 = scalar_lea.vmem %s1139_s11, 64  ;;  %p1245_p0 = scmp.ne.s32.totalorder %s1238_s25, 0 }
  0x63   : > { %v299_v8 = vsub.f32 %v289_v1, %v298_v7  ;;  %v302_v9 = vsub.f32 %v611_v2, %v298_v7  ;;  %v305_v10 = vsub.f32 %v612_v3, %v298_v7  ;;  %v308_v11 = vsub.f32 %v613_v5, %v298_v7  ;;  %p785_p8 = scmp.ne.s32.totalorder %s1139_s11, %s784_s5  ;;  %s909_s9 = smov [#allocation7]  }
  0x64   : > { %s788_s21 = sshll.u32 %s909_s9, 4  ;;  %s789_s21 = int_to_ptr.vmem [resolvable:$false] %s788_s21 }
  0x65   : > { %v300_v12 = vmul.f32 1.442695, %v299_v8  ;;  %v303_v13 = vmul.f32 1.442695, %v302_v9  ;;  %v306_v14 = vmul.f32 1.442695, %v305_v10  ;;  %p786_p11 = pnand %p785_p8, %p1245_p0  ;;  %p791_p7 = scmp.lt.s32.totalorder %s1139_s11, %s789_s21 }
  0x66   : > { %v309_v15 = vmul.f32 1.442695, %v308_v11  ;;  %v329_v1 = vld [vmem:[%s1104_s7] sm:$0x1]  ;;  %v616_v8 = vld [vmem:[%s1104_s7 + $0x1] sm:$0x1] }
  0x67   : > { %714 = vpow2.f32 %v300_v12  ;;  %v316_v11 = vld [vmem:[%s1098_s6] sm:$0x1]  ;;  %p787_p4 = pneg %p786_p11  ;;  %s790_s29 = scalar_lea.vmem %s789_s21, 128 }
  0x68   : > { %716 = vpow2.f32 %v303_v13  ;;  %v614_v13 = vld [vmem:[%s1098_s6 + $0x1] sm:$0x1]  ;;  %p792_p10 = scmp.lt.s32.totalorder %s790_s29, %s784_s5 }
  0x69   : > { %718 = vpow2.f32 %v306_v14 }
  0x6a   : > { %720 = vpow2.f32 %v309_v15  ;;  %p793_p12 = por %p792_p10, %p791_p7 }
  0x6c   : > { %p794_p9 = pnand %p793_p12, %p787_p4 }
  0x71   : > { %v715_v16 = vpop.eup %714 }
  0x72   : > { %v717_v17 = vpop.eup %716 }
  0x73   : > { %v719_v18 = vpop.eup %718  ;;  %v311_v19 = vadd.f32 %v717_v17, %v715_v16 }
  0x74   : > { %v721_v20 = vpop.eup %720 }
  0x75   : > { %v312_v21 = vadd.f32 %v719_v18, %v311_v19 }
  0x77   : > { %v313_v22 = vadd.f32 %v721_v20, %v312_v21 }
  0x79   : > { %722 = vrcp.f32 %v313_v22 }
  0x83   : > { %v723_v24 = vpop.eup %722 }
  0x84   : > { %v315_v25 = vmul.f32 %v723_v24, %v715_v16  ;;  %v339_v26 = vmul.f32 %v723_v24, %v717_v17  ;;  %v364_v27 = vmul.f32 %v723_v24, %v719_v18  ;;  %v389_v28 = vmul.f32 %v723_v24, %v721_v20  ;;  %v620_v20 = vld [vmem:[%s1104_s7 + $0x2] sm:$0x1]  ;;  %v618_v24 = vld [vmem:[%s1098_s6 + $0x2] sm:$0x1] }
  0x86   : > { %v318_v29 = vsel %vm317_vm0, %v315_v25, 0.0  ;;  %v330_v30 = vsel %vm319_vm1, %v315_v25, 0.0  ;;  %v343_v31 = vsel %vm342_vm2, %v339_v26, 0.0  ;;  %v355_v32 = vsel %vm319_vm1, %v339_v26, 0.0 }
  0x87   : > { %v320_v33 = vsel %vm319_vm1, %v318_v29, 0.0  ;;  %v331_v34 = vrot.slane %v330_v30, 4  ;;  %v344_v35 = vsel %vm319_vm1, %v343_v31, 0.0  ;;  %v356_v36 = vrot.slane %v355_v32, 4 }
  0x88   : > { %v321_v37 = vrot.slane %v320_v33, 4  ;;  %v345_v38 = vrot.slane %v344_v35, 4  ;;  %v368_v39 = vsel %vm367_vm3, %v364_v27, 0.0  ;;  %v380_v40 = vsel %vm319_vm1, %v364_v27, 0.0 }
  0x89   : > { %v332_v41 = vadd.f32 %v331_v34, %v330_v30  ;;  %v357_v42 = vadd.f32 %v356_v36, %v355_v32  ;;  %v369_v43 = vsel %vm319_vm1, %v368_v39, 0.0  ;;  %v381_v44 = vrot.slane %v380_v40, 4  ;;  %v622_v32 = vld [vmem:[%s1098_s6 + $0x3] sm:$0x1] }
  0x8a   : > { %v322_v45 = vadd.f32 %v321_v37, %v320_v33  ;;  %v346_v46 = vadd.f32 %v345_v38, %v344_v35  ;;  %v370_v47 = vrot.slane %v369_v43, 4  ;;  %v393_v48 = vsel %vm392_vm4, %v389_v28, 0.0  ;;  %v624_v38 = vld [vmem:[%s1104_s7 + $0x3] sm:$0x1] }
  0x8b   : > { %v333_v49 = vrot.slane %v332_v41, 2  ;;  %v358_v50 = vrot.slane %v357_v42, 2  ;;  %v382_v51 = vadd.f32 %v381_v44, %v380_v40  ;;  %v394_v52 = vsel %vm319_vm1, %v393_v48, 0.0 }
  0x8c   : > { %v323_v53 = vrot.slane %v322_v45, 2  ;;  %v347_v54 = vrot.slane %v346_v46, 2  ;;  %v371_v55 = vadd.f32 %v370_v47, %v369_v43  ;;  %v395_v56 = vrot.slane %v394_v52, 4 }
  0x8d   : > { %v334_v57 = vadd.f32 %v333_v49, %v332_v41  ;;  %v359_v58 = vadd.f32 %v358_v50, %v357_v42  ;;  %v383_v59 = vrot.slane %v382_v51, 2  ;;  %v405_v60 = vsel %vm319_vm1, %v389_v28, 0.0 }
  0x8e   : > { %v324_v61 = vadd.f32 %v323_v53, %v322_v45  ;;  %v348_v62 = vadd.f32 %v347_v54, %v346_v46  ;;  %v372_v63 = vrot.slane %v371_v55, 2  ;;  %v396_v0 = vadd.f32 %v395_v56, %v394_v52 }
  0x8f   : > { %v335_v2 = vrot.slane %v334_v57, 1  ;;  %v360_v3 = vrot.slane %v359_v58, 1  ;;  %v384_v4 = vadd.f32 %v383_v59, %v382_v51  ;;  %v406_v5 = vrot.slane %v405_v60, 4 }
  0x90   : > { %v325_v6 = vrot.slane %v324_v61, 1  ;;  %v349_v7 = vrot.slane %v348_v62, 1  ;;  %v373_v9 = vadd.f32 %v372_v63, %v371_v55  ;;  %v397_v10 = vrot.slane %v396_v0, 2 }
  0x91   : > { %v336_v12 = vadd.f32 %v335_v2, %v334_v57  ;;  %v361_v14 = vadd.f32 %v360_v3, %v359_v58  ;;  %v385_v15 = vrot.slane %v384_v4, 1  ;;  %v407_v16 = vadd.f32 %v406_v5, %v405_v60 }
  0x92   : > { %v326_v17 = vadd.f32 %v325_v6, %v324_v61  ;;  %v350_v18 = vadd.f32 %v349_v7, %v348_v62  ;;  %v374_v19 = vrot.slane %v373_v9, 1  ;;  %v398_v21 = vadd.f32 %v397_v10, %v396_v0 }
  0x93   : > { %v337_v22 = vadd.f32 %v336_v12, %v329_v1  ;;  %v362_v23 = vadd.f32 %v616_v8, %v361_v14  ;;  %v386_v25 = vadd.f32 %v385_v15, %v384_v4  ;;  %v408_v26 = vrot.slane %v407_v16, 2 }
  0x94   : > { %v327_v27 = vadd.f32 %v326_v17, %v316_v11  ;;  %v351_v28 = vadd.f32 %v614_v13, %v350_v18  ;;  %v375_v29 = vadd.f32 %v374_v19, %v373_v9  ;;  %v399_v30 = vrot.slane %v398_v21, 1 }
  0x95   : > { %338 = vst [vmem:[%s1104_s7] sm:$0x1] %v337_v22  ;;  %617 = vst [vmem:[%s1104_s7 + $0x1] sm:$0x1] %v362_v23  ;;  %v387_v31 = vadd.f32 %v620_v20, %v386_v25  ;;  %v409_v33 = vadd.f32 %v408_v26, %v407_v16 }
  0x96   : > { %328 = vst [vmem:[%s1098_s6] sm:$0x1] %v327_v27  ;;  %615 = vst [vmem:[%s1098_s6 + $0x1] sm:$0x1] %v351_v28  ;;  %v376_v34 = vadd.f32 %v618_v24, %v375_v29  ;;  %v400_v35 = vadd.f32 %v399_v30, %v398_v21 }
  0x97   : > { %621 = vst [vmem:[%s1104_s7 + $0x2] sm:$0x1] %v387_v31  ;;  %v410_v36 = vrot.slane %v409_v33, 1 }
  0x98   : > { %619 = vst [vmem:[%s1098_s6 + $0x2] sm:$0x1] %v376_v34  ;;  %v401_v37 = vadd.f32 %v622_v32, %v400_v35 }
  0x99   : > { %v411_v39 = vadd.f32 %v410_v36, %v409_v33 }
  0x9a   : > { %623 = vst [vmem:[%s1098_s6 + $0x3] sm:$0x1] %v401_v37 }
  0x9b   : > { %v412_v40 = vadd.f32 %v624_v38, %v411_v39 }
  0x9c   : > { %797 = shalt.err (!%p794_p9)
}
  0x9d   : > { %s798_s4 = scalar_lea.hbm %s1136_s28, 64  ;;  %s802_s15 = scalar_lea.hbm %s1232_s2, 128 }
  0x9e   : > { %p799_p1 = scmp.ne.s32.totalorder %s1136_s28, %s798_s4  ;;  %p803_p5 = scmp.lt.u32.totalorder %s1136_s28, %s1232_s2 }
  0x9f   : > { %p804_p13 = scmp.lt.u32.totalorder %s802_s15, %s798_s4  ;;  %p806_p8 = scmp.lt.u32.totalorder %s798_s4, %s1136_s28 }
  0xa0   : > { %p800_p6 = pnand %p799_p1, %p1245_p0 }
  0xa1   : > { %p805_p3 = por %p804_p13, %p803_p5 }
  0xa2   : > { %p801_p2 = pneg %p800_p6 }
  0xa3   : > { %p807_p11 = por %p806_p8, %p805_p3 }
  0xa5   : > { %p808_p4 = pnand %p807_p11, %p801_p2 }
  0xa7   : > { %811 = shalt.err (!%p808_p4)
}
  0xa8   : > { %s910_s23 = smov 16   ;;  %s911_s5 = smov 1   ;;  %625 = vst [vmem:[%s1104_s7 + $0x3] sm:$0x1] %v412_v40 }
  0xa9   : > { %641 = dma.vmem_to_hbm [thread:$0]  (%p1245_p0), %s1139_s11, 64, %s1136_s28, %s415_s10, %s910_s23, %s910_s23, %s911_s5  }
  0xaa   : > { %s420_s9 = scalar_lea.sflag [#allocation9], %s1081_s30  ;;  %s812_s21 = scalar_lea.vmem %s1150_s18, 64 }
  0xab   : > { %p813_p7 = scmp.ne.s32.totalorder %s1150_s18, %s812_s21  ;;  %s912_s29 = smov [#allocation8]  }
  0xac   : > { %s816_s4 = sshll.u32 %s912_s29, 4  ;;  %s817_s4 = int_to_ptr.vmem [resolvable:$false] %s816_s4 }
  0xad   : > { %p814_p10 = pnand %p813_p7, %p1245_p0  ;;  %s818_s6 = scalar_lea.vmem %s817_s4, 128 }
  0xae   : > { %p819_p9 = scmp.lt.s32.totalorder %s1150_s18, %s817_s4  ;;  %p820_p1 = scmp.lt.s32.totalorder %s818_s6, %s812_s21 }
  0xaf   : > { %p815_p12 = pneg %p814_p10 }
  0xb0   : > { %p821_p6 = por %p820_p1, %p819_p9 }
  0xb2   : > { %p822_p2 = pnand %p821_p6, %p815_p12 }
  0xb4   : > { %825 = shalt.err (!%p822_p2)
}
  0xb5   : > { %s826_s7 = scalar_lea.hbm %s1148_s8, 64  ;;  %s830_s10 = scalar_lea.hbm %s1233_s3, 128 }
  0xb6   : > { %p827_p5 = scmp.ne.s32.totalorder %s1148_s8, %s826_s7  ;;  %p831_p8 = scmp.lt.u32.totalorder %s1148_s8, %s1233_s3 }
  0xb7   : > { %p832_p11 = scmp.lt.u32.totalorder %s830_s10, %s826_s7  ;;  %p834_p7 = scmp.lt.u32.totalorder %s826_s7, %s1148_s8 }
  0xb8   : > { %p828_p13 = pnand %p827_p5, %p1245_p0 }
  0xb9   : > { %p833_p4 = por %p832_p11, %p831_p8 }
  0xba   : > { %p829_p3 = pneg %p828_p13 }
  0xbb   : > { %p835_p10 = por %p834_p7, %p833_p4 }
  0xbd   : > { %p836_p12 = pnand %p835_p10, %p829_p3 }
  0xbf   : > { %839 = shalt.err (!%p836_p12)
}
  0xc0   : > { %642 = dma.vmem_to_hbm [thread:$0]  (%p1245_p0), %s1150_s18, 64, %s1148_s8, %s420_s9, %s910_s23, %s910_s23, %s911_s5  }
  0xc1 PF: > { %s466_s19 = sand.u32 1, %s882_s12   ;;  %p1246_p9 = scmp.ne.s32.totalorder %s1239_s27, 0 }
  0xc2   : > { %p1247_p1 = scmp.ge.s32.totalorder %s902_s17, 2  ;;  %s467_s22 = scalar_lea.sflag [#allocation4], %s466_s19 }
  0xc4   : > { %p653_p6 = pnand %p1247_p1, %p1246_p9 }
  0xc6   : > { %873 = dma.done.wait (!%p653_p6), %s467_s22, 64  }
  0xc7   : > { %875 = vsyncadd (!%p653_p6), %s467_s22, 4294967232  ;;  %s476_s25 = scalar_lea.sflag [#allocation9], %s466_s19 }
  0xc8   : > { %877 = dma.done.wait (!%p653_p6), %s476_s25, 64  }
  0xc9   : > { %879 = vsyncadd (!%p653_p6), %s476_s25, 4294967232  ;;  %s26_s17 = sadd.s32 1, %s902_s17   ;;  %s1248_s12 = smov %s886_s13 }
  0xca   : > { %p23_p2 = scmp.ge.s32.totalorder %s26_s17, 4   ;;  %s1249_s13 = smov %s890_s14 }
  0xcb   : > { %s1250_s14 = smov %s989_s26  ;;  %s1251_s15 = smov %s898_s16 }
  0xcc   : > { %s1252_s16 = smov %s1254_s20  ;;  %25 = sbr.rel (!%p23_p2) target bundleno = 10 (0xa), region = 116 }
  0xd3   :  { %481 = vsyncpa [#allocation3], 1 }
  0xd4   :  { %483 = vsyncpa [#allocation3 + $0x1], 1 }
  0xd5   :  { %484 = vsyncpa [#allocation6], 1 }
  0xd6   :  { %486 = vsyncpa [#allocation6 + $0x1], 1 }
  0xd7   :  { %487 = vsyncpa [#allocation4], 1 }
  0xd8   :  { %489 = vsyncpa [#allocation4 + $0x1], 1 }
  0xd9   :  { %490 = vsyncpa [#allocation9], 1 }
  0xda   :  { %492 = vsyncpa [#allocation9 + $0x1], 1 }

</bundles_post_ra>
